<compile_context>
chip_gen: v7x
topology: tpu7x:2x2x1
jax: 0.10.0
libtpu: 0.0.40
codegen_flags: <defaults>
</compile_context>

<pallas_src>
import jax
import jax.numpy as jnp
from jax import lax
from jax.experimental import pallas as pl
from jax.experimental.pallas import tpu as pltpu

EPS = 1e-5                    # torch.nn.InstanceNorm2d default
MATMUL_DTYPE = jnp.bfloat16   # MXU operand dtype (set to jnp.float32 for exact f32)
MAX_SAMPLES_PER_STEP = 8      # cap on the in-kernel unroll over the batch block


def _instance_norm(y, gamma, beta):
    """Single-pass InstanceNorm with folded affine.  y: (C, HW) f32."""
    inv_hw = 1.0 / y.shape[-1]
    mean = jnp.sum(y, axis=-1, keepdims=True) * inv_hw
    mean_sq = jnp.sum(y * y, axis=-1, keepdims=True) * inv_hw
    var = mean_sq - mean * mean              # biased variance (InstanceNorm2d)
    scale = gamma * lax.rsqrt(var + EPS)     # rsqrt -> EUP slot
    shift = beta - mean * scale
    return y * scale + shift


def bottleneck_kernel(x_ref,
                      w1_ref, g1_ref, b1_ref,
                      w2_ref, g2_ref, b2_ref,
                      w3_ref, g3_ref, b3_ref,
                      o_ref):
    # x_ref: (NB, Cin, HW) f32; w*_ref: (Cout, Cin) bf16; g*/b*: (C, 1) f32.
    # NOTE: at these tiny channel counts (Cin=16, planes=4) the MXU contraction
    # is mostly padding; for production widths pad channels to multiples of 128.
    # TODO(synk): Dropout2d (dropout=True), downsample branch and kernel_size>1
    # paths are not implemented — module defaults disable all of them.
    nb = x_ref.shape[0]
    for i in range(nb):                       # small static unroll (nb <= 8)
        x = x_ref[i]                          # (Cin, HW) f32

        # conv1 (1x1) -> bn1 -> relu
        h = jnp.dot(w1_ref[...], x.astype(MATMUL_DTYPE),
                    preferred_element_type=jnp.float32)
        h = jnp.maximum(_instance_norm(h, g1_ref[...], b1_ref[...]), 0.0)

        # conv2 (1x1, stride=1) -> bn2 -> (identity dropout) -> relu
        h = jnp.dot(w2_ref[...], h.astype(MATMUL_DTYPE),
                    preferred_element_type=jnp.float32)
        h = jnp.maximum(_instance_norm(h, g2_ref[...], b2_ref[...]), 0.0)

        # conv3 (1x1) -> bn3
        h = jnp.dot(w3_ref[...], h.astype(MATMUL_DTYPE),
                    preferred_element_type=jnp.float32)
        h = _instance_norm(h, g3_ref[...], b3_ref[...])

        # residual add (downsample=None; inplanes == 4*planes) -> relu
        o_ref[i] = jnp.maximum(h + x, 0.0)


def _samples_per_step(n, cin, cout, hw):
    """Largest divisor of n (<= cap) whose f32 activation block stays small."""
    per_sample = (cin + cout) * hw * 4
    budget = 8 * 1024 * 1024
    cap = max(1, min(MAX_SAMPLES_PER_STEP, budget // max(per_sample, 1)))
    nb = 1
    for d in range(1, n + 1):
        if n % d == 0 and d <= cap:
            nb = d
    return nb


@jax.jit
def bottleneck_pallas(x_nchw, params):
    """x_nchw: (N, Cin, H, W) f32. params: PyTorch-layout weights (see make_params)."""
    N, Cin, H, W = x_nchw.shape
    HW = H * W

    # Conv weights in PyTorch layout (Cout, Cin); cast once to the MXU dtype.
    w1 = params["w1"].astype(MATMUL_DTYPE)
    w2 = params["w2"].astype(MATMUL_DTYPE)
    w3 = params["w3"].astype(MATMUL_DTYPE)
    planes, mid, Cout = w1.shape[0], w2.shape[0], w3.shape[0]
    assert Cout == Cin, "residual add requires inplanes == 4*planes (no downsample)"

    # InstanceNorm affine params as (C, 1) columns for (C, HW) broadcasting.
    g1 = params["g1"].reshape(-1, 1).astype(jnp.float32)
    b1 = params["b1"].reshape(-1, 1).astype(jnp.float32)
    g2 = params["g2"].reshape(-1, 1).astype(jnp.float32)
    b2 = params["b2"].reshape(-1, 1).astype(jnp.float32)
    g3 = params["g3"].reshape(-1, 1).astype(jnp.float32)
    b3 = params["b3"].reshape(-1, 1).astype(jnp.float32)

    # NCHW -> (N, C, HW): pure reshape, no transpose, no extra HBM traffic.
    x_flat = x_nchw.reshape(N, Cin, HW)

    NB = _samples_per_step(N, Cin, Cout, HW)
    grid = (N // NB,)

    def full(a):
        return pl.BlockSpec(a.shape, lambda n, _nd=a.ndim: (0,) * _nd)

    # VMEM budget (double-buffered activation blocks + resident params),
    # capped at 32 MiB so it is safe on v5e/v6e (128 MiB) and v7x (64 MiB).
    act_block = NB * (Cin + Cout) * HW * 4
    param_bytes = (w1.size + w2.size + w3.size) * 2 + \
                  (g1.size + b1.size + g2.size + b2.size + g3.size + b3.size) * 4
    vmem_limit = int(min(max(4 * act_block + 2 * param_bytes, 16 * 2**20), 32 * 2**20))

    matmul_flops = 2 * N * HW * (Cin * planes + planes * mid + mid * Cout)
    vpu_flops = 10 * N * HW * (planes + mid + Cout) + 2 * N * HW * Cout
    cost = pl.CostEstimate(
        flops=int(matmul_flops + vpu_flops),
        transcendentals=int(N * (planes + mid + Cout)),
        bytes_accessed=int(x_flat.size * 4 + N * Cout * HW * 4 + param_bytes),
    )

    out_flat = pl.pallas_call(
        bottleneck_kernel,
        out_shape=jax.ShapeDtypeStruct((N, Cout, HW), jnp.float32),
        grid=grid,
        in_specs=[
            pl.BlockSpec((NB, Cin, HW), lambda n: (n, 0, 0)),
            full(w1), full(g1), full(b1),
            full(w2), full(g2), full(b2),
            full(w3), full(g3), full(b3),
        ],
        out_specs=pl.BlockSpec((NB, Cout, HW), lambda n: (n, 0, 0)),
        compiler_params=pltpu.CompilerParams(
            dimension_semantics=("parallel",),
            vmem_limit_bytes=vmem_limit,
        ),
        cost_estimate=cost,
    )(x_flat, w1, g1, b1, w2, g2, b2, w3, g3, b3)

    # (N, C, HW) -> NCHW: again a pure reshape.
    return out_flat.reshape(N, Cout, H, W)


def bottleneck_ref(x_nchw, params, matmul_dtype=jnp.float32):
    """Plain-JAX reference mirroring the PyTorch forward (1x1 convs as matmuls).

    matmul_dtype lets the reference mirror the kernel's MXU operand dtype
    (accumulation and norm math are always f32).
    """
    N, Cin, H, W = x_nchw.shape
    x = x_nchw.reshape(N, Cin, H * W).astype(jnp.float32)

    def conv1x1(h, w):
        return jnp.einsum("dc,ncs->nds",
                          w.astype(matmul_dtype), h.astype(matmul_dtype),
                          preferred_element_type=jnp.float32)

    def inorm(y, g, b):
        mean = jnp.mean(y, axis=-1, keepdims=True)
        var = jnp.mean((y - mean) ** 2, axis=-1, keepdims=True)
        yn = (y - mean) / jnp.sqrt(var + EPS)
        return yn * g.reshape(1, -1, 1) + b.reshape(1, -1, 1)

    h = jnp.maximum(inorm(conv1x1(x, params["w1"]), params["g1"], params["b1"]), 0.0)
    h = jnp.maximum(inorm(conv1x1(h, params["w2"]), params["g2"], params["b2"]), 0.0)
    h = inorm(conv1x1(h, params["w3"]), params["g3"], params["b3"])
    out = jnp.maximum(h + x, 0.0)
    return out.reshape(N, -1, H, W)


def make_params(key, inplanes, planes):
    """Deterministic synthetic parameters in PyTorch layout:
    conv weights (Cout, Cin) == Conv2d.weight[:, :, 0, 0]; norm params (C,)."""
    mid_planes = planes          # compensate=False
    out_planes = planes * 4
    ks = jax.random.split(key, 9)
    s = 0.1
    return {
        "w1": s * jax.random.normal(ks[0], (planes, inplanes), jnp.float32),
        "g1": 1.0 + s * jax.random.normal(ks[1], (planes,), jnp.float32),
        "b1": s * jax.random.normal(ks[2], (planes,), jnp.float32),
        "w2": s * jax.random.normal(ks[3], (mid_planes, planes), jnp.float32),
        "g2": 1.0 + s * jax.random.normal(ks[4], (mid_planes,), jnp.float32),
        "b2": s * jax.random.normal(ks[5], (mid_planes,), jnp.float32),
        "w3": s * jax.random.normal(ks[6], (out_planes, mid_planes), jnp.float32),
        "g3": 1.0 + s * jax.random.normal(ks[7], (out_planes,), jnp.float32),
        "b3": s * jax.random.normal(ks[8], (out_planes,), jnp.float32),
    }


if __name__ == "__main__":
    # planes=4, expansion=4 -> inplanes must be 16 for the residual add
    N, planes, H, W = 2, 4, 16, 16
    inplanes = planes * 4

    key = jax.random.PRNGKey(0)
    kx, kp = jax.random.split(key)
    x = jax.random.normal(kx, (N, inplanes, H, W), jnp.float32)
    params = make_params(kp, inplanes, planes)

    out = bottleneck_pallas(x, params)
    out = jax.block_until_ready(out)

    # Reference with matched MXU operand dtype (bf16 operands, f32 accumulation
    # and norm math) — tight check of the fused kernel against module semantics.
    ref = bottleneck_ref(x, params, matmul_dtype=MATMUL_DTYPE)

    assert out.shape == (N, planes * 4, H, W)
    assert jnp.allclose(out, ref, atol=2e-3, rtol=2e-3), "mismatch vs reference"

    print("KERNEL_OK")
</pallas_src>

<mosaic_0001>
module attributes {stable_mosaic.version = 11 : i64} {
  func.func @bottleneck_kernel(%arg0: i32, %arg1: memref<2x16x256xf32, #tpu.memory_space<vmem>>, %arg2: memref<4x16xbf16, #tpu.memory_space<vmem>>, %arg3: memref<4x1xf32, #tpu.memory_space<vmem>>, %arg4: memref<4x1xf32, #tpu.memory_space<vmem>>, %arg5: memref<4x4xbf16, #tpu.memory_space<vmem>>, %arg6: memref<4x1xf32, #tpu.memory_space<vmem>>, %arg7: memref<4x1xf32, #tpu.memory_space<vmem>>, %arg8: memref<16x4xbf16, #tpu.memory_space<vmem>>, %arg9: memref<16x1xf32, #tpu.memory_space<vmem>>, %arg10: memref<16x1xf32, #tpu.memory_space<vmem>>, %arg11: memref<2x16x256xf32, #tpu.memory_space<vmem>>) attributes {dimension_semantics = [#tpu.dimension_semantics<parallel>], iteration_bounds = array<i64: 1>, scalar_prefetch = 0 : i64, scratch_operands = 0 : i64, tpu.core_type = #tpu.core_type<tc>, window_params = [{transform_indices = @transform_0, window_bounds = array<i64: 2, 16, 256>}, {pipeline_mode = #tpu.pipeline_mode<synchronous>, transform_indices = @transform_1, window_bounds = array<i64: 4, 16>}, {pipeline_mode = #tpu.pipeline_mode<synchronous>, transform_indices = @transform_2, window_bounds = array<i64: 4, 1>}, {pipeline_mode = #tpu.pipeline_mode<synchronous>, transform_indices = @transform_3, window_bounds = array<i64: 4, 1>}, {pipeline_mode = #tpu.pipeline_mode<synchronous>, transform_indices = @transform_4, window_bounds = array<i64: 4, 4>}, {pipeline_mode = #tpu.pipeline_mode<synchronous>, transform_indices = @transform_5, window_bounds = array<i64: 4, 1>}, {pipeline_mode = #tpu.pipeline_mode<synchronous>, transform_indices = @transform_6, window_bounds = array<i64: 4, 1>}, {pipeline_mode = #tpu.pipeline_mode<synchronous>, transform_indices = @transform_7, window_bounds = array<i64: 16, 4>}, {pipeline_mode = #tpu.pipeline_mode<synchronous>, transform_indices = @transform_8, window_bounds = array<i64: 16, 1>}, {pipeline_mode = #tpu.pipeline_mode<synchronous>, transform_indices = @transform_9, window_bounds = array<i64: 16, 1>}, {transform_indices = @transform_10, window_bounds = array<i64: 2, 16, 256>}]} {
    %c0 = arith.constant 0 : index
    %c0_0 = arith.constant 0 : index
    %c0_1 = arith.constant 0 : index
    %0 = vector.load %arg1[%c0, %c0_0, %c0_1] : memref<2x16x256xf32, #tpu.memory_space<vmem>>, vector<1x16x256xf32>
    %1 = vector.shape_cast %0 : vector<1x16x256xf32> to vector<16x256xf32>
    %c0_2 = arith.constant 0 : index
    %c0_3 = arith.constant 0 : index
    %2 = vector.load %arg2[%c0_2, %c0_3] : memref<4x16xbf16, #tpu.memory_space<vmem>>, vector<4x16xbf16>
    %3 = arith.truncf %1 : vector<16x256xf32> to vector<16x256xbf16>
    %cst = arith.constant dense<0.000000e+00> : vector<4x256xf32>
    %4 = tpu.matmul %2, %3, %cst {dimension_numbers = #tpu.dot_dimension_numbers<[1], [0], [0], [1], [0, 0, 1, 1], [], []>} : vector<4x16xbf16>, vector<16x256xbf16>, vector<4x256xf32> -> vector<4x256xf32>
    %c0_4 = arith.constant 0 : index
    %c0_5 = arith.constant 0 : index
    %5 = vector.load %arg3[%c0_4, %c0_5] : memref<4x1xf32, #tpu.memory_space<vmem>>, vector<4x1xf32>
    %c0_6 = arith.constant 0 : index
    %c0_7 = arith.constant 0 : index
    %6 = vector.load %arg4[%c0_6, %c0_7] : memref<4x1xf32, #tpu.memory_space<vmem>>, vector<4x1xf32>
    %cst_8 = arith.constant dense<0.000000e+00> : vector<4xf32>
    %7 = vector.multi_reduction <add>, %4, %cst_8 [1] : vector<4x256xf32> to vector<4xf32>
    %8 = vector.shape_cast %7 : vector<4xf32> to vector<4x1xf32>
    %cst_9 = arith.constant 3.906250e-03 : f32
    %9 = vector.broadcast %cst_9 : f32 to vector<4x1xf32>
    %10 = arith.mulf %8, %9 : vector<4x1xf32>
    %11 = arith.mulf %4, %4 : vector<4x256xf32>
    %cst_10 = arith.constant dense<0.000000e+00> : vector<4xf32>
    %12 = vector.multi_reduction <add>, %11, %cst_10 [1] : vector<4x256xf32> to vector<4xf32>
    %13 = vector.shape_cast %12 : vector<4xf32> to vector<4x1xf32>
    %cst_11 = arith.constant 3.906250e-03 : f32
    %14 = vector.broadcast %cst_11 : f32 to vector<4x1xf32>
    %15 = arith.mulf %13, %14 : vector<4x1xf32>
    %16 = arith.mulf %10, %10 : vector<4x1xf32>
    %17 = arith.subf %15, %16 : vector<4x1xf32>
    %cst_12 = arith.constant 9.99999974E-6 : f32
    %18 = vector.broadcast %cst_12 : f32 to vector<4x1xf32>
    %19 = arith.addf %17, %18 : vector<4x1xf32>
    %20 = math.rsqrt %19 : vector<4x1xf32>
    %21 = arith.mulf %5, %20 : vector<4x1xf32>
    %22 = arith.mulf %10, %21 : vector<4x1xf32>
    %23 = arith.subf %6, %22 : vector<4x1xf32>
    %24 = vector.broadcast %21 : vector<4x1xf32> to vector<4x256xf32>
    %25 = arith.mulf %4, %24 : vector<4x256xf32>
    %26 = vector.broadcast %23 : vector<4x1xf32> to vector<4x256xf32>
    %27 = arith.addf %25, %26 : vector<4x256xf32>
    %cst_13 = arith.constant 0.000000e+00 : f32
    %28 = vector.broadcast %cst_13 : f32 to vector<4x256xf32>
    %29 = arith.maximumf %27, %28 : vector<4x256xf32>
    %c0_14 = arith.constant 0 : index
    %c0_15 = arith.constant 0 : index
    %30 = vector.load %arg5[%c0_14, %c0_15] : memref<4x4xbf16, #tpu.memory_space<vmem>>, vector<4x4xbf16>
    %31 = arith.truncf %29 : vector<4x256xf32> to vector<4x256xbf16>
    %cst_16 = arith.constant dense<0.000000e+00> : vector<4x256xf32>
    %32 = tpu.matmul %30, %31, %cst_16 {dimension_numbers = #tpu.dot_dimension_numbers<[1], [0], [0], [1], [0, 0, 1, 1], [], []>} : vector<4x4xbf16>, vector<4x256xbf16>, vector<4x256xf32> -> vector<4x256xf32>
    %c0_17 = arith.constant 0 : index
    %c0_18 = arith.constant 0 : index
    %33 = vector.load %arg6[%c0_17, %c0_18] : memref<4x1xf32, #tpu.memory_space<vmem>>, vector<4x1xf32>
    %c0_19 = arith.constant 0 : index
    %c0_20 = arith.constant 0 : index
    %34 = vector.load %arg7[%c0_19, %c0_20] : memref<4x1xf32, #tpu.memory_space<vmem>>, vector<4x1xf32>
    %cst_21 = arith.constant dense<0.000000e+00> : vector<4xf32>
    %35 = vector.multi_reduction <add>, %32, %cst_21 [1] : vector<4x256xf32> to vector<4xf32>
    %36 = vector.shape_cast %35 : vector<4xf32> to vector<4x1xf32>
    %cst_22 = arith.constant 3.906250e-03 : f32
    %37 = vector.broadcast %cst_22 : f32 to vector<4x1xf32>
    %38 = arith.mulf %36, %37 : vector<4x1xf32>
    %39 = arith.mulf %32, %32 : vector<4x256xf32>
    %cst_23 = arith.constant dense<0.000000e+00> : vector<4xf32>
    %40 = vector.multi_reduction <add>, %39, %cst_23 [1] : vector<4x256xf32> to vector<4xf32>
    %41 = vector.shape_cast %40 : vector<4xf32> to vector<4x1xf32>
    %cst_24 = arith.constant 3.906250e-03 : f32
    %42 = vector.broadcast %cst_24 : f32 to vector<4x1xf32>
    %43 = arith.mulf %41, %42 : vector<4x1xf32>
    %44 = arith.mulf %38, %38 : vector<4x1xf32>
    %45 = arith.subf %43, %44 : vector<4x1xf32>
    %cst_25 = arith.constant 9.99999974E-6 : f32
    %46 = vector.broadcast %cst_25 : f32 to vector<4x1xf32>
    %47 = arith.addf %45, %46 : vector<4x1xf32>
    %48 = math.rsqrt %47 : vector<4x1xf32>
    %49 = arith.mulf %33, %48 : vector<4x1xf32>
    %50 = arith.mulf %38, %49 : vector<4x1xf32>
    %51 = arith.subf %34, %50 : vector<4x1xf32>
    %52 = vector.broadcast %49 : vector<4x1xf32> to vector<4x256xf32>
    %53 = arith.mulf %32, %52 : vector<4x256xf32>
    %54 = vector.broadcast %51 : vector<4x1xf32> to vector<4x256xf32>
    %55 = arith.addf %53, %54 : vector<4x256xf32>
    %cst_26 = arith.constant 0.000000e+00 : f32
    %56 = vector.broadcast %cst_26 : f32 to vector<4x256xf32>
    %57 = arith.maximumf %55, %56 : vector<4x256xf32>
    %c0_27 = arith.constant 0 : index
    %c0_28 = arith.constant 0 : index
    %58 = vector.load %arg8[%c0_27, %c0_28] : memref<16x4xbf16, #tpu.memory_space<vmem>>, vector<16x4xbf16>
    %59 = arith.truncf %57 : vector<4x256xf32> to vector<4x256xbf16>
    %cst_29 = arith.constant dense<0.000000e+00> : vector<16x256xf32>
    %60 = tpu.matmul %58, %59, %cst_29 {dimension_numbers = #tpu.dot_dimension_numbers<[1], [0], [0], [1], [0, 0, 1, 1], [], []>} : vector<16x4xbf16>, vector<4x256xbf16>, vector<16x256xf32> -> vector<16x256xf32>
    %c0_30 = arith.constant 0 : index
    %c0_31 = arith.constant 0 : index
    %61 = vector.load %arg9[%c0_30, %c0_31] : memref<16x1xf32, #tpu.memory_space<vmem>>, vector<16x1xf32>
    %c0_32 = arith.constant 0 : index
    %c0_33 = arith.constant 0 : index
    %62 = vector.load %arg10[%c0_32, %c0_33] : memref<16x1xf32, #tpu.memory_space<vmem>>, vector<16x1xf32>
    %cst_34 = arith.constant dense<0.000000e+00> : vector<16xf32>
    %63 = vector.multi_reduction <add>, %60, %cst_34 [1] : vector<16x256xf32> to vector<16xf32>
    %64 = vector.shape_cast %63 : vector<16xf32> to vector<16x1xf32>
    %cst_35 = arith.constant 3.906250e-03 : f32
    %65 = vector.broadcast %cst_35 : f32 to vector<16x1xf32>
    %66 = arith.mulf %64, %65 : vector<16x1xf32>
    %67 = arith.mulf %60, %60 : vector<16x256xf32>
    %cst_36 = arith.constant dense<0.000000e+00> : vector<16xf32>
    %68 = vector.multi_reduction <add>, %67, %cst_36 [1] : vector<16x256xf32> to vector<16xf32>
    %69 = vector.shape_cast %68 : vector<16xf32> to vector<16x1xf32>
    %cst_37 = arith.constant 3.906250e-03 : f32
    %70 = vector.broadcast %cst_37 : f32 to vector<16x1xf32>
    %71 = arith.mulf %69, %70 : vector<16x1xf32>
    %72 = arith.mulf %66, %66 : vector<16x1xf32>
    %73 = arith.subf %71, %72 : vector<16x1xf32>
    %cst_38 = arith.constant 9.99999974E-6 : f32
    %74 = vector.broadcast %cst_38 : f32 to vector<16x1xf32>
    %75 = arith.addf %73, %74 : vector<16x1xf32>
    %76 = math.rsqrt %75 : vector<16x1xf32>
    %77 = arith.mulf %61, %76 : vector<16x1xf32>
    %78 = arith.mulf %66, %77 : vector<16x1xf32>
    %79 = arith.subf %62, %78 : vector<16x1xf32>
    %80 = vector.broadcast %77 : vector<16x1xf32> to vector<16x256xf32>
    %81 = arith.mulf %60, %80 : vector<16x256xf32>
    %82 = vector.broadcast %79 : vector<16x1xf32> to vector<16x256xf32>
    %83 = arith.addf %81, %82 : vector<16x256xf32>
    %84 = arith.addf %83, %1 : vector<16x256xf32>
    %cst_39 = arith.constant 0.000000e+00 : f32
    %85 = vector.broadcast %cst_39 : f32 to vector<16x256xf32>
    %86 = arith.maximumf %84, %85 : vector<16x256xf32>
    %c0_40 = arith.constant 0 : index
    %c0_41 = arith.constant 0 : index
    %c0_42 = arith.constant 0 : index
    %87 = vector.load %arg11[%c0_40, %c0_41, %c0_42] : memref<2x16x256xf32, #tpu.memory_space<vmem>>, vector<1x16x256xf32>
    %88 = vector.shape_cast %87 : vector<1x16x256xf32> to vector<16x256xf32>
    %89 = vector.shape_cast %86 : vector<16x256xf32> to vector<1x16x256xf32>
    tpu.vector_store %arg11[%c0_40, %c0_41, %c0_42], %89 {strides = array<i32>} : memref<2x16x256xf32, #tpu.memory_space<vmem>>, vector<1x16x256xf32>,
    %c1 = arith.constant 1 : index
    %c0_43 = arith.constant 0 : index
    %c0_44 = arith.constant 0 : index
    %90 = vector.load %arg1[%c1, %c0_43, %c0_44] : memref<2x16x256xf32, #tpu.memory_space<vmem>>, vector<1x16x256xf32>
    %91 = vector.shape_cast %90 : vector<1x16x256xf32> to vector<16x256xf32>
    %c0_45 = arith.constant 0 : index
    %c0_46 = arith.constant 0 : index
    %92 = vector.load %arg2[%c0_45, %c0_46] : memref<4x16xbf16, #tpu.memory_space<vmem>>, vector<4x16xbf16>
    %93 = arith.truncf %91 : vector<16x256xf32> to vector<16x256xbf16>
    %cst_47 = arith.constant dense<0.000000e+00> : vector<4x256xf32>
    %94 = tpu.matmul %92, %93, %cst_47 {dimension_numbers = #tpu.dot_dimension_numbers<[1], [0], [0], [1], [0, 0, 1, 1], [], []>} : vector<4x16xbf16>, vector<16x256xbf16>, vector<4x256xf32> -> vector<4x256xf32>
    %c0_48 = arith.constant 0 : index
    %c0_49 = arith.constant 0 : index
    %95 = vector.load %arg3[%c0_48, %c0_49] : memref<4x1xf32, #tpu.memory_space<vmem>>, vector<4x1xf32>
    %c0_50 = arith.constant 0 : index
    %c0_51 = arith.constant 0 : index
    %96 = vector.load %arg4[%c0_50, %c0_51] : memref<4x1xf32, #tpu.memory_space<vmem>>, vector<4x1xf32>
    %cst_52 = arith.constant dense<0.000000e+00> : vector<4xf32>
    %97 = vector.multi_reduction <add>, %94, %cst_52 [1] : vector<4x256xf32> to vector<4xf32>
    %98 = vector.shape_cast %97 : vector<4xf32> to vector<4x1xf32>
    %cst_53 = arith.constant 3.906250e-03 : f32
    %99 = vector.broadcast %cst_53 : f32 to vector<4x1xf32>
    %100 = arith.mulf %98, %99 : vector<4x1xf32>
    %101 = arith.mulf %94, %94 : vector<4x256xf32>
    %cst_54 = arith.constant dense<0.000000e+00> : vector<4xf32>
    %102 = vector.multi_reduction <add>, %101, %cst_54 [1] : vector<4x256xf32> to vector<4xf32>
    %103 = vector.shape_cast %102 : vector<4xf32> to vector<4x1xf32>
    %cst_55 = arith.constant 3.906250e-03 : f32
    %104 = vector.broadcast %cst_55 : f32 to vector<4x1xf32>
    %105 = arith.mulf %103, %104 : vector<4x1xf32>
    %106 = arith.mulf %100, %100 : vector<4x1xf32>
    %107 = arith.subf %105, %106 : vector<4x1xf32>
    %cst_56 = arith.constant 9.99999974E-6 : f32
    %108 = vector.broadcast %cst_56 : f32 to vector<4x1xf32>
    %109 = arith.addf %107, %108 : vector<4x1xf32>
    %110 = math.rsqrt %109 : vector<4x1xf32>
    %111 = arith.mulf %95, %110 : vector<4x1xf32>
    %112 = arith.mulf %100, %111 : vector<4x1xf32>
    %113 = arith.subf %96, %112 : vector<4x1xf32>
    %114 = vector.broadcast %111 : vector<4x1xf32> to vector<4x256xf32>
    %115 = arith.mulf %94, %114 : vector<4x256xf32>
    %116 = vector.broadcast %113 : vector<4x1xf32> to vector<4x256xf32>
    %117 = arith.addf %115, %116 : vector<4x256xf32>
    %cst_57 = arith.constant 0.000000e+00 : f32
    %118 = vector.broadcast %cst_57 : f32 to vector<4x256xf32>
    %119 = arith.maximumf %117, %118 : vector<4x256xf32>
    %c0_58 = arith.constant 0 : index
    %c0_59 = arith.constant 0 : index
    %120 = vector.load %arg5[%c0_58, %c0_59] : memref<4x4xbf16, #tpu.memory_space<vmem>>, vector<4x4xbf16>
    %121 = arith.truncf %119 : vector<4x256xf32> to vector<4x256xbf16>
    %cst_60 = arith.constant dense<0.000000e+00> : vector<4x256xf32>
    %122 = tpu.matmul %120, %121, %cst_60 {dimension_numbers = #tpu.dot_dimension_numbers<[1], [0], [0], [1], [0, 0, 1, 1], [], []>} : vector<4x4xbf16>, vector<4x256xbf16>, vector<4x256xf32> -> vector<4x256xf32>
    %c0_61 = arith.constant 0 : index
    %c0_62 = arith.constant 0 : index
    %123 = vector.load %arg6[%c0_61, %c0_62] : memref<4x1xf32, #tpu.memory_space<vmem>>, vector<4x1xf32>
    %c0_63 = arith.constant 0 : index
    %c0_64 = arith.constant 0 : index
    %124 = vector.load %arg7[%c0_63, %c0_64] : memref<4x1xf32, #tpu.memory_space<vmem>>, vector<4x1xf32>
    %cst_65 = arith.constant dense<0.000000e+00> : vector<4xf32>
    %125 = vector.multi_reduction <add>, %122, %cst_65 [1] : vector<4x256xf32> to vector<4xf32>
    %126 = vector.shape_cast %125 : vector<4xf32> to vector<4x1xf32>
    %cst_66 = arith.constant 3.906250e-03 : f32
    %127 = vector.broadcast %cst_66 : f32 to vector<4x1xf32>
    %128 = arith.mulf %126, %127 : vector<4x1xf32>
    %129 = arith.mulf %122, %122 : vector<4x256xf32>
    %cst_67 = arith.constant dense<0.000000e+00> : vector<4xf32>
    %130 = vector.multi_reduction <add>, %129, %cst_67 [1] : vector<4x256xf32> to vector<4xf32>
    %131 = vector.shape_cast %130 : vector<4xf32> to vector<4x1xf32>
    %cst_68 = arith.constant 3.906250e-03 : f32
    %132 = vector.broadcast %cst_68 : f32 to vector<4x1xf32>
    %133 = arith.mulf %131, %132 : vector<4x1xf32>
    %134 = arith.mulf %128, %128 : vector<4x1xf32>
    %135 = arith.subf %133, %134 : vector<4x1xf32>
    %cst_69 = arith.constant 9.99999974E-6 : f32
    %136 = vector.broadcast %cst_69 : f32 to vector<4x1xf32>
    %137 = arith.addf %135, %136 : vector<4x1xf32>
    %138 = math.rsqrt %137 : vector<4x1xf32>
    %139 = arith.mulf %123, %138 : vector<4x1xf32>
    %140 = arith.mulf %128, %139 : vector<4x1xf32>
    %141 = arith.subf %124, %140 : vector<4x1xf32>
    %142 = vector.broadcast %139 : vector<4x1xf32> to vector<4x256xf32>
    %143 = arith.mulf %122, %142 : vector<4x256xf32>
    %144 = vector.broadcast %141 : vector<4x1xf32> to vector<4x256xf32>
    %145 = arith.addf %143, %144 : vector<4x256xf32>
    %cst_70 = arith.constant 0.000000e+00 : f32
    %146 = vector.broadcast %cst_70 : f32 to vector<4x256xf32>
    %147 = arith.maximumf %145, %146 : vector<4x256xf32>
    %c0_71 = arith.constant 0 : index
    %c0_72 = arith.constant 0 : index
    %148 = vector.load %arg8[%c0_71, %c0_72] : memref<16x4xbf16, #tpu.memory_space<vmem>>, vector<16x4xbf16>
    %149 = arith.truncf %147 : vector<4x256xf32> to vector<4x256xbf16>
    %cst_73 = arith.constant dense<0.000000e+00> : vector<16x256xf32>
    %150 = tpu.matmul %148, %149, %cst_73 {dimension_numbers = #tpu.dot_dimension_numbers<[1], [0], [0], [1], [0, 0, 1, 1], [], []>} : vector<16x4xbf16>, vector<4x256xbf16>, vector<16x256xf32> -> vector<16x256xf32>
    %c0_74 = arith.constant 0 : index
    %c0_75 = arith.constant 0 : index
    %151 = vector.load %arg9[%c0_74, %c0_75] : memref<16x1xf32, #tpu.memory_space<vmem>>, vector<16x1xf32>
    %c0_76 = arith.constant 0 : index
    %c0_77 = arith.constant 0 : index
    %152 = vector.load %arg10[%c0_76, %c0_77] : memref<16x1xf32, #tpu.memory_space<vmem>>, vector<16x1xf32>
    %cst_78 = arith.constant dense<0.000000e+00> : vector<16xf32>
    %153 = vector.multi_reduction <add>, %150, %cst_78 [1] : vector<16x256xf32> to vector<16xf32>
    %154 = vector.shape_cast %153 : vector<16xf32> to vector<16x1xf32>
    %cst_79 = arith.constant 3.906250e-03 : f32
    %155 = vector.broadcast %cst_79 : f32 to vector<16x1xf32>
    %156 = arith.mulf %154, %155 : vector<16x1xf32>
    %157 = arith.mulf %150, %150 : vector<16x256xf32>
    %cst_80 = arith.constant dense<0.000000e+00> : vector<16xf32>
    %158 = vector.multi_reduction <add>, %157, %cst_80 [1] : vector<16x256xf32> to vector<16xf32>
    %159 = vector.shape_cast %158 : vector<16xf32> to vector<16x1xf32>
    %cst_81 = arith.constant 3.906250e-03 : f32
    %160 = vector.broadcast %cst_81 : f32 to vector<16x1xf32>
    %161 = arith.mulf %159, %160 : vector<16x1xf32>
    %162 = arith.mulf %156, %156 : vector<16x1xf32>
    %163 = arith.subf %161, %162 : vector<16x1xf32>
    %cst_82 = arith.constant 9.99999974E-6 : f32
    %164 = vector.broadcast %cst_82 : f32 to vector<16x1xf32>
    %165 = arith.addf %163, %164 : vector<16x1xf32>
    %166 = math.rsqrt %165 : vector<16x1xf32>
    %167 = arith.mulf %151, %166 : vector<16x1xf32>
    %168 = arith.mulf %156, %167 : vector<16x1xf32>
    %169 = arith.subf %152, %168 : vector<16x1xf32>
    %170 = vector.broadcast %167 : vector<16x1xf32> to vector<16x256xf32>
    %171 = arith.mulf %150, %170 : vector<16x256xf32>
    %172 = vector.broadcast %169 : vector<16x1xf32> to vector<16x256xf32>
    %173 = arith.addf %171, %172 : vector<16x256xf32>
    %174 = arith.addf %173, %91 : vector<16x256xf32>
    %cst_83 = arith.constant 0.000000e+00 : f32
    %175 = vector.broadcast %cst_83 : f32 to vector<16x256xf32>
    %176 = arith.maximumf %174, %175 : vector<16x256xf32>
    %c1_84 = arith.constant 1 : index
    %c0_85 = arith.constant 0 : index
    %c0_86 = arith.constant 0 : index
    %177 = vector.load %arg11[%c1_84, %c0_85, %c0_86] : memref<2x16x256xf32, #tpu.memory_space<vmem>>, vector<1x16x256xf32>
    %178 = vector.shape_cast %177 : vector<1x16x256xf32> to vector<16x256xf32>
    %179 = vector.shape_cast %176 : vector<16x256xf32> to vector<1x16x256xf32>
    tpu.vector_store %arg11[%c1_84, %c0_85, %c0_86], %179 {strides = array<i32>} : memref<2x16x256xf32, #tpu.memory_space<vmem>>, vector<1x16x256xf32>,
    return
  }
  func.func @transform_0(%arg0: i32) -> (i32, i32, i32) {
    %c0_i32 = arith.constant 0 : i32
    %c0_i32_0 = arith.constant 0 : i32
    %c0_i32_1 = arith.constant 0 : i32
    return %arg0, %c0_i32, %c0_i32_0 : i32, i32, i32
  }
  func.func @transform_1(%arg0: i32) -> (i32, i32) {
    %c0_i32 = arith.constant 0 : i32
    %c0_i32_0 = arith.constant 0 : i32
    %c0_i32_1 = arith.constant 0 : i32
    return %c0_i32, %c0_i32_0 : i32, i32
  }
  func.func @transform_2(%arg0: i32) -> (i32, i32) {
    %c0_i32 = arith.constant 0 : i32
    %c0_i32_0 = arith.constant 0 : i32
    %c0_i32_1 = arith.constant 0 : i32
    return %c0_i32, %c0_i32_0 : i32, i32
  }
  func.func @transform_3(%arg0: i32) -> (i32, i32) {
    %c0_i32 = arith.constant 0 : i32
    %c0_i32_0 = arith.constant 0 : i32
    %c0_i32_1 = arith.constant 0 : i32
    return %c0_i32, %c0_i32_0 : i32, i32
  }
  func.func @transform_4(%arg0: i32) -> (i32, i32) {
    %c0_i32 = arith.constant 0 : i32
    %c0_i32_0 = arith.constant 0 : i32
    %c0_i32_1 = arith.constant 0 : i32
    return %c0_i32, %c0_i32_0 : i32, i32
  }
  func.func @transform_5(%arg0: i32) -> (i32, i32) {
    %c0_i32 = arith.constant 0 : i32
    %c0_i32_0 = arith.constant 0 : i32
    %c0_i32_1 = arith.constant 0 : i32
    return %c0_i32, %c0_i32_0 : i32, i32
  }
  func.func @transform_6(%arg0: i32) -> (i32, i32) {
    %c0_i32 = arith.constant 0 : i32
    %c0_i32_0 = arith.constant 0 : i32
    %c0_i32_1 = arith.constant 0 : i32
    return %c0_i32, %c0_i32_0 : i32, i32
  }
  func.func @transform_7(%arg0: i32) -> (i32, i32) {
    %c0_i32 = arith.constant 0 : i32
    %c0_i32_0 = arith.constant 0 : i32
    %c0_i32_1 = arith.constant 0 : i32
    return %c0_i32, %c0_i32_0 : i32, i32
  }
  func.func @transform_8(%arg0: i32) -> (i32, i32) {
    %c0_i32 = arith.constant 0 : i32
    %c0_i32_0 = arith.constant 0 : i32
    %c0_i32_1 = arith.constant 0 : i32
    return %c0_i32, %c0_i32_0 : i32, i32
  }
  func.func @transform_9(%arg0: i32) -> (i32, i32) {
    %c0_i32 = arith.constant 0 : i32
    %c0_i32_0 = arith.constant 0 : i32
    %c0_i32_1 = arith.constant 0 : i32
    return %c0_i32, %c0_i32_0 : i32, i32
  }
  func.func @transform_10(%arg0: i32) -> (i32, i32, i32) {
    %c0_i32 = arith.constant 0 : i32
    %c0_i32_0 = arith.constant 0 : i32
    %c0_i32_1 = arith.constant 0 : i32
    return %arg0, %c0_i32, %c0_i32_0 : i32, i32, i32
  }
}

</mosaic_0001>

<bundles_post_ra>
// kernel: bottleneck_pallas.1
= control target key start
LH: loop header
LB: loop body
LE: loop exit
PB: predicated region body
PF: predicated region fallthrough
CT: control target
= control target key end

     0   :  { %v729_v3 = vmov 0   ;;  %vm43_vm0 = vcmask 130048   ;;  %vm90_vm1 = vcmask 1043456   ;;  %vm135_vm2 = vcmask 1041408   ;;  %s1029_s0 = inlined_call_operand.vmem [shape: f32[2,16,256], index: 0, kind: input, shape index: {}]   ;;  %s1030_s1 = inlined_call_operand.vmem [shape: bf16[4,16], index: 1, kind: input, shape index: {}]   ;;  %s1031_s2 = inlined_call_operand.vmem [shape: f32[4,1], index: 2, kind: input, shape index: {}]   ;;  %s1032_s3 = inlined_call_operand.vmem [shape: f32[4,1], index: 3, kind: input, shape index: {}]   ;;  %s1033_s4 = inlined_call_operand.vmem [shape: bf16[4,4], index: 4, kind: input, shape index: {}]   ;;  %s1034_s5 = inlined_call_operand.vmem [shape: f32[4,1], index: 5, kind: input, shape index: {}]   ;;  %s1035_s6 = inlined_call_operand.vmem [shape: f32[4,1], index: 6, kind: input, shape index: {}]   ;;  %s1036_s7 = inlined_call_operand.vmem [shape: bf16[16,4], index: 7, kind: input, shape index: {}]   ;;  %s1037_s8 = inlined_call_operand.vmem [shape: f32[16,1], index: 8, kind: input, shape index: {}]   ;;  %s1038_s9 = inlined_call_operand.vmem [shape: f32[16,1], index: 9, kind: input, shape index: {}]   ;;  %s1039_s10 = inlined_call_operand.vmem [shape: f32[2,16,256], index: 10, kind: output, shape index: {}]  }
   0x1   :  { %v788_v0 = vld [vmem:[%s1029_s0 + $0x8] sm:$0xff]  ;;  %v793_v1 = vld [vmem:[%s1029_s0 + $0x18] sm:$0xff]  ;;  %v798_v2 = vld [vmem:[%s1029_s0] sm:$0xff]  ;;  %79 = vmatprep.mubr.bf16.mxu0 %v729_v3  ;;  %709 = vset.pattern.permute.xlu1 %v729_v3  ;;  %vm131_vm3 = vcmask 31744  }
   0x2   :  { %v42_v4 = vpack.c.bf16 %v793_v1, %v788_v0  ;;  %v807_v5 = vld [vmem:[%s1029_s0 + $0x10] sm:$0xff]  ;;  %174 = vmatprep.mubr.bf16.mxu1 %v729_v3  ;;  %710 = vset.pattern.permute.xlu0 %v729_v3  ;;  %v40_v7 = vld [vmem:[%s1030_s1] sm:$0x3]  ;;  %v831_v39 = vld [vmem:[%s1029_s0 + $0x28] sm:$0xff] }
   0x3   :  { %v41_v6 = vpack.c.bf16 %v807_v5, %v798_v2  ;;  %v88_v27 = vld [vmem:[%s1031_s2] sm:$0xf]  ;;  %v836_v40 = vld [vmem:[%s1029_s0 + $0x38] sm:$0xff]  ;;  %v848_v47 = vld [vmem:[%s1029_s0 + $0x30] sm:$0xff] }
   0x4   :  { %47 = vmatprep.subr.bf16.mxu0 %v42_v4  ;;  %v89_v30 = vld [vmem:[%s1032_s3] sm:$0xf]  ;;  %v368_v45 = vpack.c.bf16 %v836_v40, %v831_v39 }
   0x5   :  { %48 = vmatpush1.bf16.msra.mxu0 %v41_v6  ;;  %v843_v46 = vld [vmem:[%s1029_s0 + $0x20] sm:$0xff] }
   0x6   :  { %v128_v49 = vld [vmem:[%s1033_s4] sm:$0x3]  ;;  %v367_v50 = vpack.c.bf16 %v848_v47, %v843_v46 }
   0x7   :  { %v366_v51 = vld [vmem:[%s1030_s1] sm:$0x3] }
   0x8   :  { %688 = vmatmul.mubr.msk.bf16.vlgmr.msra.gmra.mrb[0].mxu0 %vm43_vm0, %v40_v7 }
   0x9   :  { %272 = vmatprep.mubr.bf16.mxu0 %v729_v3 }
  0xdb   :  { %v81_v8 = vpop.f32.mrb[0].mxu0 }
  0xdc   :  { %v97_v9 = vmul.f32 %v81_v8, %v81_v8  ;;  %v83_v10 = vpop.f32.mrb[1].mxu0  ;;  %v91_v11 = vsel %vm90_vm1, %v81_v8, 0.0 }
  0xdd   :  { %v98_v12 = vmul.f32 %v83_v10, %v83_v10  ;;  %v85_v13 = vpop.f32.mrb[2].mxu0  ;;  %v92_v14 = vsel %vm90_vm1, %v83_v10, 0.0 }
  0xde   :  { %v86_v15 = vpop.f32.mrb[3].mxu0  ;;  %v93_v16 = vadd.f32 %v92_v14, %v91_v11  ;;  %v99_v17 = vsel %vm90_vm1, %v97_v9, 0.0 }
  0xdf   :  { %v100_v18 = vsel %vm90_vm1, %v98_v12, 0.0 }
  0xe0   :  { %94 = vadd.xlane.f32.xlu0 %v93_v16  ;;  %v101_v19 = vadd.f32 %v100_v18, %v99_v17 }
  0xe4   :  { %102 = vadd.xlane.f32.xlu0 %v101_v19 }
 0x16d   :  { %v95_v20 = vpop.xlane.xlu0 %94 }
 0x16e   :  { %v96_v21 = vmul.f32 0.00390625, %v95_v20 }
 0x170   :  { %v105_v23 = vmul.f32 %v96_v21, %v96_v21 }
 0x171   :  { %v103_v22 = vpop.xlane.xlu0 %102 }
 0x172   :  { %v104_v24 = vmul.f32 0.00390625, %v103_v22 }
 0x174   :  { %v106_v25 = vsub.f32 %v104_v24, %v105_v23 }
 0x176   :  { %v107_v26 = vadd.f32 1e-05, %v106_v25 }
 0x178   :  { %713 = vrsqrt.f32 %v107_v26 }
 0x182   :  { %v714_v28 = vpop.eup %713 }
 0x183   :  { %v109_v29 = vmul.f32 %v714_v28, %v88_v27 }
 0x185   :  { %114 = vperm.xlu1 %709, %v109_v29   ;;  %v110_v31 = vmul.f32 %v109_v29, %v96_v21 }
 0x187   :  { %v111_v32 = vsub.f32 %v89_v30, %v110_v31  ;;  %v183_v31 = vld [vmem:[%s1034_s5] sm:$0xf] }
 0x189   :  { %121 = vperm.xlu1 %709, %v111_v32  }
 0x204   :  { %v115_v33 = vpop.permute.xlu1 %114 }
 0x205   :  { %v117_v34 = vmul.f32 %v115_v33, %v81_v8  ;;  %v118_v35 = vmul.f32 %v115_v33, %v83_v10 }
 0x208   :  { %v122_v36 = vpop.permute.xlu1 %121 }
 0x209   :  { %v124_v37 = vadd.f32 %v122_v36, %v117_v34  ;;  %v125_v38 = vadd.f32 %v122_v36, %v118_v35  ;;  %v184_v34 = vld [vmem:[%s1035_s6] sm:$0xf] }
 0x20b   :  { %v126_v41 = vmax.f32 %v124_v37, 0.0  ;;  %v127_v42 = vmax.f32 %v125_v38, 0.0  ;;  %v413_v37 = vld [vmem:[%s1031_s2] sm:$0xf] }
 0x20d   :  { %v130_v43 = vpack.c.bf16 %v127_v42, %v127_v42  ;;  %v129_v44 = vpack.c.bf16 %v126_v41, %v126_v41  ;;  %v414_v42 = vld [vmem:[%s1032_s3] sm:$0xf] }
 0x20f   :  { %689 = vmatprep.subr.msk.bf16.mxu1 %vm135_vm2, %v130_v43  ;;  %v137_v48 = vsel %vm135_vm2, %v129_v44, 0 }
 0x210   :  { %143 = vmatpush1.bf16.msra.mxu1 %v137_v48 }
 0x211   :  { %372 = vmatprep.subr.bf16.mxu1 %v368_v45 }
 0x213   :  { %690 = vmatmul.mubr.msk.bf16.vlgmr.msra.gmra.mrb[0].mxu1 %vm131_vm3, %v128_v49 }
 0x214   :  { %373 = vmatpush1.bf16.msra.mxu1 %v367_v50  ;;  %404 = vmatprep.mubr.bf16.mxu1 %v729_v3 }
 0x21b   :  { %698 = vmatmul.mubr.msk.bf16.vlgmr.msra.gmra.mrb[4].mxu1 %vm43_vm0, %v366_v51 }
 0x21c   :  { %594 = vmatprep.mubr.bf16.mxu1 %v729_v3 }
 0x2e6   :  { %v864_v52 = vpop.f32.mrb[0].mxu1 }
 0x2e7   :  { %v191_v53 = vmul.f32 %v864_v52, %v864_v52  ;;  %v868_v54 = vpop.f32.mrb[1].mxu1  ;;  %v185_v55 = vsel %vm90_vm1, %v864_v52, 0.0 }
 0x2e8   :  { %v192_v56 = vmul.f32 %v868_v54, %v868_v54  ;;  %v180_v57 = vpop.f32.mrb[2].mxu1  ;;  %v186_v58 = vsel %vm90_vm1, %v868_v54, 0.0 }
 0x2e9   :  { %v181_v59 = vpop.f32.mrb[3].mxu1  ;;  %v187_v60 = vadd.f32 %v186_v58, %v185_v55  ;;  %v193_v61 = vsel %vm90_vm1, %v191_v53, 0.0 }
 0x2ea   :  { %v194_v62 = vsel %vm90_vm1, %v192_v56, 0.0 }
 0x2eb   :  { %188 = vadd.xlane.f32.xlu0 %v187_v60  ;;  %v195_v63 = vadd.f32 %v194_v62, %v193_v61  ;;  %v711_v61 = vld [vmem:[%s1036_s7] sm:$0xff]  }
 0x2ed   :  { %196 = vadd.xlane.f32.xlu1 %v195_v63 }
 0x2ee   :  { %v878_v4 = vpop.f32.mrb[4].mxu1 }
 0x2ef   :  { %v421_v6 = vmul.f32 %v878_v4, %v878_v4  ;;  %v882_v7 = vpop.f32.mrb[5].mxu1  ;;  %v415_v8 = vsel %vm90_vm1, %v878_v4, 0.0 }
 0x2f0   :  { %v422_v9 = vmul.f32 %v882_v7, %v882_v7  ;;  %v410_v10 = vpop.f32.mrb[6].mxu1  ;;  %v416_v11 = vsel %vm90_vm1, %v882_v7, 0.0 }
 0x2f1   :  { %v411_v12 = vpop.f32.mrb[7].mxu1  ;;  %v417_v13 = vadd.f32 %v416_v11, %v415_v8  ;;  %v423_v14 = vsel %vm90_vm1, %v421_v6, 0.0 }
 0x2f2   :  { %v424_v15 = vsel %vm90_vm1, %v422_v9, 0.0 }
 0x2f3   :  { %418 = vadd.xlane.f32.xlu0 %v417_v13  ;;  %v425_v16 = vadd.f32 %v424_v15, %v423_v14 }
 0x2f7   :  { %426 = vadd.xlane.f32.xlu0 %v425_v16 }
 0x378   :  { %v189_v17 = vpop.xlane.xlu0 %188 }
 0x379   :  { %v190_v18 = vmul.f32 0.00390625, %v189_v17 }
 0x37a   :  { %v197_v19 = vpop.xlane.xlu1 %196 }
 0x37b   :  { %v199_v20 = vmul.f32 %v190_v18, %v190_v18  ;;  %v198_v21 = vmul.f32 0.00390625, %v197_v19 }
 0x37d   :  { %v200_v22 = vsub.f32 %v198_v21, %v199_v20 }
 0x37f   :  { %v201_v23 = vadd.f32 1e-05, %v200_v22 }
 0x380   :  { %v419_v24 = vpop.xlane.xlu0 %418 }
 0x381   :  { %715 = vrsqrt.f32 %v201_v23  ;;  %v420_v25 = vmul.f32 0.00390625, %v419_v24 }
 0x383   :  { %v429_v27 = vmul.f32 %v420_v25, %v420_v25 }
 0x384   :  { %v427_v26 = vpop.xlane.xlu0 %426 }
 0x385   :  { %v428_v28 = vmul.f32 0.00390625, %v427_v26 }
 0x387   :  { %v430_v29 = vsub.f32 %v428_v28, %v429_v27 }
 0x389   :  { %v431_v30 = vadd.f32 1e-05, %v430_v29 }
 0x38b   :  { %v716_v32 = vpop.eup %715  ;;  %717 = vrsqrt.f32 %v431_v30 }
 0x38c   :  { %v203_v33 = vmul.f32 %v716_v32, %v183_v31 }
 0x38e   :  { %208 = vperm.xlu0 %710, %v203_v33   ;;  %v204_v35 = vmul.f32 %v203_v33, %v190_v18 }
 0x390   :  { %v205_v36 = vsub.f32 %v184_v34, %v204_v35 }
 0x392   :  { %215 = vperm.xlu1 %709, %v205_v36  }
 0x395   :  { %v718_v38 = vpop.eup %717 }
 0x396   :  { %v433_v41 = vmul.f32 %v718_v38, %v413_v37 }
 0x398   :  { %438 = vperm.xlu1 %709, %v433_v41   ;;  %v434_v43 = vmul.f32 %v433_v41, %v420_v25 }
 0x39a   :  { %v435_v44 = vsub.f32 %v414_v42, %v434_v43 }
 0x39c   :  { %445 = vperm.xlu0 %710, %v435_v44   ;;  %v505_v44 = vld [vmem:[%s1034_s5] sm:$0xf] }
 0x40d   :  { %v209_v45 = vpop.permute.xlu0 %208 }
 0x40e   :  { %v211_v48 = vmul.f32 %v209_v45, %v864_v52  ;;  %v212_v49 = vmul.f32 %v209_v45, %v868_v54 }
 0x411   :  { %v216_v50 = vpop.permute.xlu1 %215 }
 0x412   :  { %v218_v51 = vadd.f32 %v216_v50, %v211_v48  ;;  %v219_v53 = vadd.f32 %v216_v50, %v212_v49  ;;  %v506_v49 = vld [vmem:[%s1035_s6] sm:$0xf] }
 0x414   :  { %v220_v55 = vmax.f32 %v218_v51, 0.0  ;;  %v221_v56 = vmax.f32 %v219_v53, 0.0 }
 0x416   :  { %v224_v57 = vpack.c.bf16 %v220_v55, %v220_v55  ;;  %v225_v58 = vpack.c.bf16 %v221_v56, %v221_v56 }
 0x417   :  { %v439_v59 = vpop.permute.xlu1 %438 }
 0x418   :  { %692 = vmatprep.subr.msk.bf16.mxu0 %vm135_vm2, %v225_v58  ;;  %v235_v60 = vsel %vm135_vm2, %v224_v57, 0  ;;  %v441_v52 = vmul.f32 %v439_v59, %v878_v4  ;;  %v442_v54 = vmul.f32 %v439_v59, %v882_v7  ;;  %v452_v4 = vld [vmem:[%s1033_s4] sm:$0x3] }
 0x419   :  { %241 = vmatpush1.bf16.msra.mxu0 %v235_v60 }
 0x41b   :  { %v446_v62 = vpop.permute.xlu0 %445 }
 0x41c   :  { %v448_v63 = vadd.f32 %v446_v62, %v441_v52  ;;  %v449_v6 = vadd.f32 %v446_v62, %v442_v54  ;;  %693 = vmatmul.mubr.msk.bf16.vlgmr.msra.gmra.mrb[4].mxu0 %vm131_vm3, %v711_v61 }
 0x41d   :  { %496 = vmatprep.mubr.bf16.mxu0 %v729_v3 }
 0x41e   :  { %v450_v8 = vmax.f32 %v448_v63, 0.0  ;;  %v451_v9 = vmax.f32 %v449_v6, 0.0  ;;  %v712_v63 = vld [vmem:[%s1036_s7] sm:$0xff]  }
 0x420   :  { %v453_v10 = vpack.c.bf16 %v450_v8, %v450_v8  ;;  %v454_v11 = vpack.c.bf16 %v451_v9, %v451_v9 }
 0x422   :  { %699 = vmatprep.subr.msk.bf16.mxu0 %vm135_vm2, %v454_v11  ;;  %v459_v12 = vsel %vm135_vm2, %v453_v10, 0 }
 0x423   :  { %465 = vmatpush1.bf16.msra.mxu0 %v459_v12 }
 0x426   :  { %700 = vmatmul.mubr.msk.bf16.vlgmr.msra.gmra.mrb[8].mxu0 %vm131_vm3, %v452_v4 }
 0x4ef   :  { %v921_v7 = vpop.f32.mrb[4].mxu0 }
 0x4f0   :  { %v923_v13 = vpop.f32.mrb[5].mxu0  ;;  %v295_v3 = vmul.f32 %v921_v7, %v921_v7 }
 0x4f1   :  { %v927_v14 = vpop.f32.mrb[6].mxu0  ;;  %v296_v15 = vmul.f32 %v923_v13, %v923_v13  ;;  %v287_v16 = vadd.f32 %v923_v13, %v921_v7 }
 0x4f2   :  { %v933_v17 = vpop.f32.mrb[7].mxu0  ;;  %v297_v18 = vmul.f32 %v927_v14, %v927_v14 }
 0x4f3   :  { %v290_v19 = vadd.f32 %v933_v17, %v927_v14  ;;  %v299_v20 = vadd.f32 %v296_v15, %v295_v3  ;;  %v298_v21 = vmul.f32 %v933_v17, %v933_v17 }
 0x4f5   :  { %v302_v22 = vadd.f32 %v298_v21, %v297_v18 }
 0x4f9   :  { %v498_v23 = vpop.f32.mrb[8].mxu0 }
 0x4fa   :  { %v513_v24 = vmul.f32 %v498_v23, %v498_v23  ;;  %v500_v25 = vpop.f32.mrb[9].mxu0  ;;  %v507_v26 = vsel %vm90_vm1, %v498_v23, 0.0 }
 0x4fb   :  { %v514_v27 = vmul.f32 %v500_v25, %v500_v25  ;;  %v502_v28 = vpop.f32.mrb[10].mxu0  ;;  %v508_v29 = vsel %vm90_vm1, %v500_v25, 0.0 }
 0x4fc   :  { %v503_v30 = vpop.f32.mrb[11].mxu0  ;;  %v509_v31 = vadd.f32 %v508_v29, %v507_v26  ;;  %v515_v32 = vsel %vm90_vm1, %v513_v24, 0.0 }
 0x4fd   :  { %v516_v33 = vsel %vm90_vm1, %v514_v27, 0.0 }
 0x4fe   :  { %510 = vadd.xlane.f32.xlu1 %v509_v31  ;;  %v517_v34 = vadd.f32 %v516_v33, %v515_v32 }
 0x500   :  { %518 = vadd.xlane.f32.xlu0 %v517_v34 }
 0x58b   :  { %v511_v35 = vpop.xlane.xlu1 %510 }
 0x58c   :  { %v512_v36 = vmul.f32 0.00390625, %v511_v35  ;;  %v283_v35 = vld [vmem:[%s1037_s8] sm:$0xff] }
 0x58d   :  { %v519_v37 = vpop.xlane.xlu0 %518 }
 0x58e   :  { %v521_v38 = vmul.f32 %v512_v36, %v512_v36  ;;  %v520_v41 = vmul.f32 0.00390625, %v519_v37 }
 0x590   :  { %v522_v42 = vsub.f32 %v520_v41, %v521_v38  ;;  %v284_v38 = vld [vmem:[%s1037_s8 + $0x8] sm:$0xff] }
 0x592   :  { %v523_v43 = vadd.f32 1e-05, %v522_v42 }
 0x594   :  { %719 = vrsqrt.f32 %v523_v43  ;;  %v285_v43 = vld [vmem:[%s1038_s9] sm:$0xff] }
 0x59e   :  { %v720_v45 = vpop.eup %719 }
 0x59f   :  { %v525_v48 = vmul.f32 %v720_v45, %v505_v44 }
 0x5a1   :  { %530 = vperm.xlu0 %710, %v525_v48   ;;  %v526_v50 = vmul.f32 %v525_v48, %v512_v36  ;;  %v286_v48 = vld [vmem:[%s1038_s9 + $0x8] sm:$0xff] }
 0x5a3   :  { %v527_v51 = vsub.f32 %v506_v49, %v526_v50 }
 0x5a5   :  { %537 = vperm.xlu1 %709, %v527_v51  }
 0x5c0   :  { %291 = vadd.xlane.f32.xlu0 %v290_v19 }
 0x5c4   :  { %300 = vadd.xlane.f32.xlu0 %v299_v20 }
 0x5c9   :  { %288 = vadd.xlane.f32.xlu1 %v287_v16 }
 0x5cd   :  { %303 = vadd.xlane.f32.xlu1 %v302_v22 }
 0x620   :  { %v531_v53 = vpop.permute.xlu0 %530 }
 0x621   :  { %v533_v55 = vmul.f32 %v531_v53, %v498_v23  ;;  %v534_v56 = vmul.f32 %v531_v53, %v500_v25 }
 0x624   :  { %v538_v57 = vpop.permute.xlu1 %537 }
 0x625   :  { %v540_v58 = vadd.f32 %v538_v57, %v533_v55  ;;  %v541_v59 = vadd.f32 %v538_v57, %v534_v56 }
 0x627   :  { %v542_v60 = vmax.f32 %v540_v58, 0.0  ;;  %v543_v61 = vmax.f32 %v541_v59, 0.0 }
 0x629   :  { %v546_v52 = vpack.c.bf16 %v542_v60, %v542_v60  ;;  %v547_v54 = vpack.c.bf16 %v543_v61, %v543_v61 }
 0x62b   :  { %702 = vmatprep.subr.msk.bf16.mxu1 %vm135_vm2, %v547_v54  ;;  %v557_v62 = vsel %vm135_vm2, %v546_v52, 0 }
 0x62c   :  { %563 = vmatpush1.bf16.msra.mxu1 %v557_v62 }
 0x62f   :  { %703 = vmatmul.mubr.msk.bf16.vlgmr.msra.gmra.mrb[8].mxu1 %vm131_vm3, %v712_v63 }
 0x64d   :  { %v292_v6 = vpop.xlane.xlu0 %291 }
 0x64e   :  { %v294_v4 = vmul.f32 0.00390625, %v292_v6 }
 0x650   :  { %v308_v19 = vmul.f32 %v294_v4, %v294_v4 }
 0x651   :  { %v301_v10 = vpop.xlane.xlu0 %300 }
 0x652   :  { %v305_v3 = vmul.f32 0.00390625, %v301_v10 }
 0x656   :  { %v289_v8 = vpop.xlane.xlu1 %288 }
 0x657   :  { %v293_v9 = vmul.f32 0.00390625, %v289_v8 }
 0x659   :  { %v307_v11 = vmul.f32 %v293_v9, %v293_v9 }
 0x65a   :  { %v304_v12 = vpop.xlane.xlu1 %303 }
 0x65b   :  { %v306_v15 = vmul.f32 0.00390625, %v304_v12  ;;  %v309_v16 = vsub.f32 %v305_v3, %v307_v11 }
 0x65d   :  { %v310_v25 = vsub.f32 %v306_v15, %v308_v19  ;;  %v311_v28 = vadd.f32 1e-05, %v309_v16 }
 0x65f   :  { %v312_v33 = vadd.f32 1e-05, %v310_v25  ;;  %721 = vrsqrt.f32 %v311_v28 }
 0x661   :  { %723 = vrsqrt.f32 %v312_v33 }
 0x669   :  { %v722_v34 = vpop.eup %721 }
 0x66a   :  { %v315_v37 = vmul.f32 %v722_v34, %v283_v35 }
 0x66b   :  { %v724_v36 = vpop.eup %723 }
 0x66c   :  { %v316_v41 = vmul.f32 %v724_v36, %v284_v38  ;;  %v317_v42 = vmul.f32 %v315_v37, %v293_v9 }
 0x66e   :  { %v318_v44 = vmul.f32 %v316_v41, %v294_v4  ;;  %v319_v45 = vsub.f32 %v285_v43, %v317_v42 }
 0x670   :  { %v320_v49 = vsub.f32 %v286_v48, %v318_v44 }
 0x702   :  { %v957_v18 = vpop.f32.mrb[8].mxu1 }
 0x703   :  { %v959_v20 = vpop.f32.mrb[9].mxu1  ;;  %v617_v21 = vmul.f32 %v957_v18, %v957_v18 }
 0x704   :  { %v963_v22 = vpop.f32.mrb[10].mxu1  ;;  %v609_v23 = vadd.f32 %v959_v20, %v957_v18  ;;  %v618_v24 = vmul.f32 %v959_v20, %v959_v20 }
 0x705   :  { %v969_v26 = vpop.f32.mrb[11].mxu1  ;;  %v619_v27 = vmul.f32 %v963_v22, %v963_v22 }
 0x706   :  { %v620_v29 = vmul.f32 %v969_v26, %v969_v26  ;;  %610 = vadd.xlane.f32.xlu0 %v609_v23  ;;  %v612_v30 = vadd.f32 %v969_v26, %v963_v22  ;;  %v621_v31 = vadd.f32 %v618_v24, %v617_v21 }
 0x708   :  { %613 = vadd.xlane.f32.xlu1 %v612_v30  ;;  %v624_v32 = vadd.f32 %v620_v29, %v619_v27 }
 0x70a   :  { %622 = vadd.xlane.f32.xlu0 %v621_v31 }
 0x70c   :  { %625 = vadd.xlane.f32.xlu1 %v624_v32 }
 0x71d   :  { %328 = vperm.xlu1 %709, %v316_v41  }
 0x720   :  { %323 = vperm.xlu0 %710, %v315_v37  }
 0x721   :  { %337 = vperm.xlu1 %709, %v319_v45  }
 0x724   :  { %342 = vperm.xlu0 %710, %v320_v49  }
 0x793   :  { %v611_v50 = vpop.xlane.xlu0 %610 }
 0x794   :  { %v615_v51 = vmul.f32 0.00390625, %v611_v50 }
 0x795   :  { %v614_v53 = vpop.xlane.xlu1 %613 }
 0x796   :  { %v616_v55 = vmul.f32 0.00390625, %v614_v53  ;;  %v629_v57 = vmul.f32 %v615_v51, %v615_v51 }
 0x797   :  { %v623_v56 = vpop.xlane.xlu0 %622 }
 0x798   :  { %v627_v58 = vmul.f32 0.00390625, %v623_v56  ;;  %v630_v60 = vmul.f32 %v616_v55, %v616_v55 }
 0x799   :  { %v626_v59 = vpop.xlane.xlu1 %625 }
 0x79a   :  { %v631_v61 = vsub.f32 %v627_v58, %v629_v57  ;;  %v628_v52 = vmul.f32 0.00390625, %v626_v59 }
 0x79c   :  { %v633_v54 = vadd.f32 1e-05, %v631_v61  ;;  %v632_v62 = vsub.f32 %v628_v52, %v630_v60 }
 0x79d   :  { %v329_v63 = vpop.permute.xlu1 %328 }
 0x79e   :  { %725 = vrsqrt.f32 %v633_v54  ;;  %v634_v6 = vadd.f32 1e-05, %v632_v62  ;;  %v333_v12 = vmul.f32 %v329_v63, %v927_v14  ;;  %v334_v4 = vmul.f32 %v329_v63, %v933_v17 }
 0x79f   :  { %v324_v8 = vpop.permute.xlu0 %323 }
 0x7a0   :  { %727 = vrsqrt.f32 %v634_v6  ;;  %v331_v9 = vmul.f32 %v324_v8, %v921_v7  ;;  %v332_v10 = vmul.f32 %v324_v8, %v923_v13 }
 0x7a1   :  { %v338_v11 = vpop.permute.xlu1 %337 }
 0x7a2   :  { %v345_v3 = vadd.f32 %v338_v11, %v331_v9  ;;  %v346_v15 = vadd.f32 %v338_v11, %v332_v10 }
 0x7a3   :  { %v343_v16 = vpop.permute.xlu0 %342 }
 0x7a4   :  { %v349_v19 = vadd.f32 %v345_v3, %v798_v2  ;;  %v350_v21 = vadd.f32 %v346_v15, %v788_v0  ;;  %v347_v23 = vadd.f32 %v343_v16, %v333_v12  ;;  %v348_v24 = vadd.f32 %v343_v16, %v334_v4 }
 0x7a6   :  { %v353_v25 = vmax.f32 %v349_v19, 0.0  ;;  %v354_v27 = vmax.f32 %v350_v21, 0.0  ;;  %v351_v7 = vadd.f32 %v347_v23, %v807_v5  ;;  %v352_v13 = vadd.f32 %v348_v24, %v793_v1 }
 0x7a8   :  { %v726_v28 = vpop.eup %725  ;;  %357 = vst [vmem:[%s1039_s10] sm:$0xff] %v353_v25  ;;  %358 = vst [vmem:[%s1039_s10 + $0x8] sm:$0xff] %v354_v27  ;;  %v355_v2 = vmax.f32 %v351_v7, 0.0  ;;  %v356_v14 = vmax.f32 %v352_v13, 0.0 }
 0x7a9   :  { %v637_v0 = vmul.f32 %v726_v28, %v283_v35 }
 0x7aa   :  { %v728_v17 = vpop.eup %727  ;;  %359 = vst [vmem:[%s1039_s10 + $0x10] sm:$0xff] %v355_v2  ;;  %360 = vst [vmem:[%s1039_s10 + $0x18] sm:$0xff] %v356_v14 }
 0x7ab   :  { %645 = vperm.xlu1 %709, %v637_v0   ;;  %v638_v1 = vmul.f32 %v728_v17, %v284_v38  ;;  %v639_v5 = vmul.f32 %v637_v0, %v615_v51 }
 0x7ad   :  { %650 = vperm.xlu0 %710, %v638_v1   ;;  %v641_v29 = vsub.f32 %v285_v43, %v639_v5  ;;  %v640_v30 = vmul.f32 %v638_v1, %v616_v55 }
 0x7af   :  { %659 = vperm.xlu1 %709, %v641_v29   ;;  %v642_v31 = vsub.f32 %v286_v48, %v640_v30 }
 0x7b1   :  { %664 = vperm.xlu0 %710, %v642_v31  }
 0x82a   :  { %v646_v32 = vpop.permute.xlu1 %645 }
 0x82b   :  { %v653_v34 = vmul.f32 %v646_v32, %v957_v18  ;;  %v654_v35 = vmul.f32 %v646_v32, %v959_v20 }
 0x82c   :  { %v651_v33 = vpop.permute.xlu0 %650 }
 0x82d   :  { %v655_v37 = vmul.f32 %v651_v33, %v963_v22  ;;  %v656_v41 = vmul.f32 %v651_v33, %v969_v26 }
 0x82e   :  { %v660_v36 = vpop.permute.xlu1 %659 }
 0x82f   :  { %v667_v42 = vadd.f32 %v660_v36, %v653_v34  ;;  %v668_v38 = vadd.f32 %v660_v36, %v654_v35 }
 0x830   :  { %v665_v44 = vpop.permute.xlu0 %664 }
 0x831   :  { %v671_v43 = vadd.f32 %v843_v46, %v667_v42  ;;  %v672_v45 = vadd.f32 %v831_v39, %v668_v38  ;;  %v669_v48 = vadd.f32 %v665_v44, %v655_v37  ;;  %v670_v49 = vadd.f32 %v665_v44, %v656_v41 }
 0x833   :  { %v675_v50 = vmax.f32 %v671_v43, 0.0  ;;  %v676_v51 = vmax.f32 %v672_v45, 0.0  ;;  %v673_v18 = vadd.f32 %v848_v47, %v669_v48  ;;  %v674_v20 = vadd.f32 %v836_v40, %v670_v49 }
 0x835   :  { %704 = vst [vmem:[%s1039_s10 + $0x20] sm:$0xff] %v675_v50  ;;  %705 = vst [vmem:[%s1039_s10 + $0x28] sm:$0xff] %v676_v51  ;;  %v677_v22 = vmax.f32 %v673_v18, 0.0  ;;  %v678_v46 = vmax.f32 %v674_v20, 0.0 }
 0x837   :  { %706 = vst [vmem:[%s1039_s10 + $0x30] sm:$0xff] %v677_v22  ;;  %707 = vst [vmem:[%s1039_s10 + $0x38] sm:$0xff] %v678_v46 }

</bundles_post_ra>
